<compile_context>
chip_gen: v5e
topology: v5e:2x2
jax: 0.10.0
libtpu: 0.0.40
codegen_flags: <defaults>
</compile_context>

<pallas_src>
import functools
import math

import jax
import jax.numpy as jnp
from jax import lax
from jax.experimental import pallas as pl
from jax.experimental.pallas import tpu as pltpu


def _reward_criterion_kernel(pred_ref, seq_ref, reward_ref, out_ref, *,
                             seq_len, total_rows, ragged):
    """One grid step: partial [num, den] sums over a (tb, L) row block.

    The block layout is either the natural (B, T) layout (L == seq_len) or a
    lane-flattened (B*T/L, L) layout with L a multiple of both 128 and
    seq_len.  In both cases original-sentence starts sit at lanes where
    (lane % seq_len) == 0, which is exactly where the shifted-token mask must
    be forced to 1 — this also overrides the circular wrap of pltpu.roll at
    column 0 and at every sentence boundary inside a flattened row.
    """
    pred = pred_ref[...].astype(jnp.float32)      # (tb, L)
    reward = reward_ref[...].astype(jnp.float32)  # (tb, L) or (tb, 1)
    seq = seq_ref[...]                            # (tb, L) integer

    tb, width = pred.shape

    tok = (seq > 0).astype(jnp.float32)
    tok_prev = pltpu.roll(tok, shift=1, axis=1)           # circular within rows
    col = lax.broadcasted_iota(jnp.int32, (1, width), 1)  # lane index
    first_tok = (col % seq_len) == 0                      # (1, L), broadcast below
    mask = jnp.where(first_tok, 1.0, tok_prev)            # (tb, L) f32

    contrib = pred * reward * mask     # reward broadcasts if (tb, 1); sign in wrapper

    if ragged:
        # Partial last block only: zero out-of-range rows.  This also guards
        # against NaN/Inf in the unspecified out-of-bounds block data.
        row = pl.program_id(0) * tb + lax.broadcasted_iota(jnp.int32, (tb, 1), 0)
        valid = row < total_rows                           # (tb, 1)
        mask = jnp.where(valid, mask, 0.0)
        contrib = jnp.where(valid, contrib, 0.0)

    num = jnp.sum(contrib)       # f32 accumulation
    den = jnp.sum(mask)

    # Lane-dense partial output: lane 0 = num, lane 1 = den, rest 0.
    lane = lax.broadcasted_iota(jnp.int32, (1, 1, 128), 2)
    out_ref[...] = jnp.where(lane == 0, num, jnp.where(lane == 1, den, 0.0))


def _vmem_budgets():
    """(vmem_limit_bytes, double-buffered input byte budget), per generation."""
    try:
        cap = int(pltpu.get_tpu_info().vmem_capacity_bytes)
    except Exception:
        cap = 64 * 1024 * 1024          # assume the smallest part (v7x) if unknown
    limit = min((cap * 3) // 4, 96 * 1024 * 1024)     # 96 MiB v5e/v6e, 48 MiB v7x
    budget = min((limit * 3) // 4, 64 * 1024 * 1024)  # 64 MiB v5e/v6e, 36 MiB v7x
    return limit, budget


def reward_criterion(pred, seq, reward, *, block_rows=None):
    """Pallas equivalent of RewardCriterion.forward(pred, seq, reward).

    block_rows: optional row-tile override (testing / tuning); rows are counted
    in the (possibly lane-flattened) layout.
    """
    pred = jnp.asarray(pred)
    seq = jnp.asarray(seq)
    reward = jnp.asarray(reward)

    # Keep bf16 inputs as-is (halves HBM traffic); anything else goes to f32.
    if pred.dtype not in (jnp.bfloat16, jnp.float32):
        pred = pred.astype(jnp.float32)
    if reward.dtype not in (jnp.bfloat16, jnp.float32):
        reward = reward.astype(jnp.float32)
    if not jnp.issubdtype(seq.dtype, jnp.integer):
        seq = seq.astype(jnp.int32)

    B, T = pred.shape
    assert seq.shape == (B, T), seq.shape
    assert reward.shape in ((B, T), (B, 1)), reward.shape
    reward_per_sentence = reward.shape == (B, 1)

    # ---- Layout: lane-flatten the time axis when T is lane-sparse. ---------
    # Group g consecutive sentences per row so g*T is a multiple of 128; the
    # reshape of a contiguous (B, T) array is free.
    R, L = B, T
    if (T % 128 != 0) and not reward_per_sentence:
        g = 128 // math.gcd(T, 128)
        if g > 1 and B % g == 0:
            R, L = B // g, g * T
            pred = pred.reshape(R, L)
            seq = seq.reshape(R, L)
            reward = reward.reshape(R, L)
    # TODO(synk): when B % g != 0 or reward is per-sentence we fall back to the
    # lane-sparse (B, T) layout; padding B to a multiple of g would cost an
    # extra HBM pass in the wrapper, so it is not done here.
    Lr = reward.shape[1]            # L or 1

    # ---- Byte-based tile sizing against a generation-aware VMEM budget. ----
    sub = 8
    if (pred.dtype == jnp.bfloat16 or reward.dtype == jnp.bfloat16
            or seq.dtype in (jnp.int16, jnp.uint16)):
        sub = 16
    if seq.dtype in (jnp.int8, jnp.uint8):
        sub = 32

    vmem_limit, input_budget = _vmem_budgets()
    row_bytes = (L * (jnp.dtype(pred.dtype).itemsize
                      + jnp.dtype(seq.dtype).itemsize)
                 + Lr * jnp.dtype(reward.dtype).itemsize)

    if block_rows is not None:
        tb = min(R, int(block_rows))
    else:
        tb = min(R, max(sub, input_budget // (2 * row_bytes)))
    if tb < R:
        tb = max(sub, (tb // sub) * sub)     # sublane-align strict sub-blocks
        tb = min(tb, R)                      # (block == full dim is always legal)
    grid = pl.cdiv(R, tb)
    ragged = (R % tb) != 0

    kernel = functools.partial(_reward_criterion_kernel, seq_len=T,
                               total_rows=R, ragged=ragged)

    def run(dim_sem):
        return pl.pallas_call(
            kernel,
            out_shape=jax.ShapeDtypeStruct((grid, 1, 128), jnp.float32),
            grid_spec=pltpu.PrefetchScalarGridSpec(
                num_scalar_prefetch=0,
                grid=(grid,),
                in_specs=[
                    pl.BlockSpec((tb, L), lambda i: (i, 0)),    # pred
                    pl.BlockSpec((tb, L), lambda i: (i, 0)),    # seq
                    pl.BlockSpec((tb, Lr), lambda i: (i, 0)),   # reward
                ],
                out_specs=pl.BlockSpec((1, 1, 128), lambda i: (i, 0, 0)),
            ),
            compiler_params=pltpu.CompilerParams(
                dimension_semantics=dim_sem,
                vmem_limit_bytes=vmem_limit,
            ),
        )(pred, seq, reward)

    if grid > 1:
        # Engage both v7x TensorCores; per-block partial outputs are disjoint
        # so the grid axis is core-safe.  Fall back if this chip / grid shape
        # rejects core_parallel.
        try:
            partials = jax.block_until_ready(run((pltpu.CORE_PARALLEL,)))
        except Exception:
            partials = run(("parallel",))
    else:
        partials = run(("arbitrary",))

    num = jnp.sum(partials[:, 0, 0])
    den = jnp.sum(partials[:, 0, 1])    # >= B (mask[:,0] forced to 1), never zero
    return -(num / den)                 # negation folded out of the kernel


def reward_criterion_ref(pred, seq, reward):
    """Pure-JAX reference mirroring the PyTorch module exactly (f32)."""
    pred = pred.astype(jnp.float32)
    reward = reward.astype(jnp.float32)
    mask = (seq > 0).astype(jnp.float32)
    mask = jnp.concatenate(
        [jnp.ones((mask.shape[0], 1), jnp.float32), mask[:, :-1]], axis=1
    ).reshape(-1)
    p = pred.reshape(-1)
    r = reward.reshape(-1)
    out = -p * r * mask
    return jnp.sum(out) / jnp.sum(mask)


if __name__ == "__main__":
    # 1) Tiny shapes consistent with the module (B=2, T=8): fallback (B, T)
    #    layout (g=16 > B), single full block.
    key = jax.random.PRNGKey(0)
    k1, k2, k3 = jax.random.split(key, 3)
    B, T = 2, 8
    pred = -jax.random.uniform(k1, (B, T), jnp.float32, 0.1, 5.0)
    seq = jax.random.randint(k2, (B, T), 0, 10, jnp.int32)
    seq = seq.at[0, 5:].set(0).at[1, 6:].set(0)
    reward = jax.random.uniform(k3, (B, T), jnp.float32, -1.0, 1.0)
    out = jax.block_until_ready(reward_criterion(pred, seq, reward))
    ref = jax.block_until_ready(reward_criterion_ref(pred, seq, reward))
    assert jnp.allclose(out, ref, rtol=1e-5, atol=1e-5), (out, ref)

    # 2) Per-sentence (B, 1) reward -> fallback layout; ragged multi-block grid
    #    (exercises the row-validity path and the CORE_PARALLEL attempt).
    B2, T2 = 40, 16
    kk = jax.random.split(jax.random.PRNGKey(0), 3)
    pred2 = -jax.random.uniform(kk[0], (B2, T2), jnp.float32, 0.1, 5.0)
    seq2 = jax.random.randint(kk[1], (B2, T2), 0, 6, jnp.int32)
    reward_sent = jax.random.uniform(kk[2], (B2, 1), jnp.float32, -1.0, 1.0)
    out2 = jax.block_until_ready(
        reward_criterion(pred2, seq2, reward_sent, block_rows=16))
    ref2 = jax.block_until_ready(
        reward_criterion_ref(pred2, seq2, jnp.broadcast_to(reward_sent, (B2, T2))))
    assert jnp.allclose(out2, ref2, rtol=1e-5, atol=1e-5), (out2, ref2)

    # 3) Lane-flattened layout (T=16 -> 8 sentences per 128-lane row), bf16
    #    activations and int8 seq (HBM-byte reduction); single full block.
    B3, T3 = 32, 16
    kb = jax.random.split(jax.random.PRNGKey(1), 3)
    pred3 = (-jax.random.uniform(kb[0], (B3, T3), jnp.float32, 0.1, 5.0)
             ).astype(jnp.bfloat16)
    seq3 = jax.random.randint(kb[1], (B3, T3), 0, 6, jnp.int32).astype(jnp.int8)
    reward3 = jax.random.uniform(kb[2], (B3, T3), jnp.float32, -1.0, 1.0
                                 ).astype(jnp.bfloat16)
    out3 = jax.block_until_ready(reward_criterion(pred3, seq3, reward3))
    ref3 = jax.block_until_ready(
        reward_criterion_ref(pred3.astype(jnp.float32), seq3.astype(jnp.int32),
                             reward3.astype(jnp.float32)))
    assert jnp.allclose(out3, ref3, rtol=1e-4, atol=1e-4), (out3, ref3)

    # 4) Lane-flattened + ragged multi-block grid (R=17 flattened rows, tb=8).
    B4, T4 = 136, 16
    kc = jax.random.split(jax.random.PRNGKey(2), 3)
    pred4 = -jax.random.uniform(kc[0], (B4, T4), jnp.float32, 0.1, 5.0)
    seq4 = jax.random.randint(kc[1], (B4, T4), 0, 6, jnp.int32)
    reward4 = jax.random.uniform(kc[2], (B4, T4), jnp.float32, -1.0, 1.0)
    out4 = jax.block_until_ready(
        reward_criterion(pred4, seq4, reward4, block_rows=8))
    ref4 = jax.block_until_ready(reward_criterion_ref(pred4, seq4, reward4))
    assert jnp.allclose(out4, ref4, rtol=1e-5, atol=1e-5), (out4, ref4)

    print("KERNEL_OK")
</pallas_src>

<mosaic_0001>
module attributes {stable_mosaic.version = 11 : i64} {
  func.func @_reward_criterion_kernel(%arg0: i32, %arg1: memref<2x8xf32, #tpu.memory_space<vmem>>, %arg2: memref<2x8xi32, #tpu.memory_space<vmem>>, %arg3: memref<2x8xf32, #tpu.memory_space<vmem>>, %arg4: memref<1x1x128xf32, #tpu.memory_space<vmem>>) attributes {dimension_semantics = [#tpu.dimension_semantics<arbitrary>], iteration_bounds = array<i64: 1>, scalar_prefetch = 0 : i64, scratch_operands = 0 : i64, tpu.core_type = #tpu.core_type<tc>, window_params = [{transform_indices = @transform_0, window_bounds = array<i64: 2, 8>}, {transform_indices = @transform_1, window_bounds = array<i64: 2, 8>}, {transform_indices = @transform_2, window_bounds = array<i64: 2, 8>}, {transform_indices = @transform_3, window_bounds = array<i64: 1, 1, 128>}]} {
    %c0 = arith.constant 0 : index
    %c0_0 = arith.constant 0 : index
    %0 = vector.load %arg1[%c0, %c0_0] : memref<2x8xf32, #tpu.memory_space<vmem>>, vector<2x8xf32>
    %c0_1 = arith.constant 0 : index
    %c0_2 = arith.constant 0 : index
    %1 = vector.load %arg3[%c0_1, %c0_2] : memref<2x8xf32, #tpu.memory_space<vmem>>, vector<2x8xf32>
    %c0_3 = arith.constant 0 : index
    %c0_4 = arith.constant 0 : index
    %2 = vector.load %arg2[%c0_3, %c0_4] : memref<2x8xi32, #tpu.memory_space<vmem>>, vector<2x8xi32>
    %c0_i32 = arith.constant 0 : i32
    %3 = vector.broadcast %c0_i32 : i32 to vector<2x8xi32>
    %4 = arith.cmpi sgt, %2, %3 : vector<2x8xi32>
    %5 = arith.extui %4 : vector<2x8xi1> to vector<2x8xi32>
    %6 = arith.sitofp %5 : vector<2x8xi32> to vector<2x8xf32>
    %c1_i32 = arith.constant 1 : i32
    %7 = tpu.dynamic_rotate %6 by %c1_i32 dim 1 : vector<2x8xf32>, i32 -> vector<2x8xf32>
    %8 = tpu.iota {dimensions = array<i32: 1>} : vector<1x8xi32>
    %c8_i32 = arith.constant 8 : i32
    %c0_i32_5 = arith.constant 0 : i32
    %9 = arith.cmpi eq, %c8_i32, %c0_i32_5 : i32
    %c1_i32_6 = arith.constant 1 : i32
    %10 = arith.select %9, %c1_i32_6, %c8_i32 : i32
    %11 = vector.broadcast %10 : i32 to vector<1x8xi32>
    %12 = arith.remsi %8, %11 : vector<1x8xi32>
    %c0_i32_7 = arith.constant 0 : i32
    %13 = vector.broadcast %c0_i32_7 : i32 to vector<1x8xi32>
    %14 = arith.cmpi ne, %12, %13 : vector<1x8xi32>
    %c0_i32_8 = arith.constant 0 : i32
    %15 = vector.broadcast %c0_i32_8 : i32 to vector<1x8xi32>
    %16 = arith.cmpi slt, %12, %15 : vector<1x8xi32>
    %c0_i32_9 = arith.constant 0 : i32
    %17 = arith.cmpi slt, %10, %c0_i32_9 : i32
    %18 = vector.broadcast %17 : i1 to vector<1x8xi1>
    %19 = vector.broadcast %18 : vector<1x8xi1> to vector<1x8xi1>
    %20 = arith.xori %16, %19 : vector<1x8xi1>
    %21 = arith.andi %20, %14 : vector<1x8xi1>
    %22 = vector.broadcast %10 : i32 to vector<1x8xi32>
    %23 = arith.addi %12, %22 : vector<1x8xi32>
    %24 = arith.select %21, %23, %12 : vector<1x8xi1>, vector<1x8xi32>
    %c0_i32_10 = arith.constant 0 : i32
    %25 = vector.broadcast %c0_i32_10 : i32 to vector<1x8xi32>
    %26 = arith.cmpi eq, %24, %25 : vector<1x8xi32>
    %cst = arith.constant 1.000000e+00 : f32
    %27 = vector.shape_cast %26 : vector<1x8xi1> to vector<1x8xi1>
    %28 = vector.broadcast %27 : vector<1x8xi1> to vector<2x8xi1>
    %29 = vector.broadcast %cst : f32 to vector<2x8xf32>
    %30 = arith.select %28, %29, %7 : vector<2x8xi1>, vector<2x8xf32>
    %31 = arith.mulf %0, %1 : vector<2x8xf32>
    %32 = arith.mulf %31, %30 : vector<2x8xf32>
    %33 = vector.shape_cast %32 : vector<2x8xf32> to vector<1x2x8xf32>
    %cst_11 = arith.constant dense<0.000000e+00> : vector<1xf32>
    %34 = vector.multi_reduction <add>, %33, %cst_11 [1, 2] : vector<1x2x8xf32> to vector<1xf32>
    %35 = vector.shape_cast %34 : vector<1xf32> to vector<1x1x1xf32>
    %36 = vector.extract %35[0, 0, 0] : f32 from vector<1x1x1xf32>
    %37 = vector.shape_cast %30 : vector<2x8xf32> to vector<1x2x8xf32>
    %cst_12 = arith.constant dense<0.000000e+00> : vector<1xf32>
    %38 = vector.multi_reduction <add>, %37, %cst_12 [1, 2] : vector<1x2x8xf32> to vector<1xf32>
    %39 = vector.shape_cast %38 : vector<1xf32> to vector<1x1x1xf32>
    %40 = vector.extract %39[0, 0, 0] : f32 from vector<1x1x1xf32>
    %41 = tpu.iota {dimensions = array<i32: 2>} : vector<1x1x128xi32>
    %c0_i32_13 = arith.constant 0 : i32
    %42 = vector.broadcast %c0_i32_13 : i32 to vector<1x1x128xi32>
    %43 = arith.cmpi eq, %41, %42 : vector<1x1x128xi32>
    %c1_i32_14 = arith.constant 1 : i32
    %44 = vector.broadcast %c1_i32_14 : i32 to vector<1x1x128xi32>
    %45 = arith.cmpi eq, %41, %44 : vector<1x1x128xi32>
    %cst_15 = arith.constant 0.000000e+00 : f32
    %46 = vector.broadcast %40 : f32 to vector<1x1x128xf32>
    %47 = vector.broadcast %cst_15 : f32 to vector<1x1x128xf32>
    %48 = arith.select %45, %46, %47 : vector<1x1x128xi1>, vector<1x1x128xf32>
    %49 = vector.broadcast %36 : f32 to vector<1x1x128xf32>
    %50 = arith.select %43, %49, %48 : vector<1x1x128xi1>, vector<1x1x128xf32>
    %c0_16 = arith.constant 0 : index
    %c0_17 = arith.constant 0 : index
    %c0_18 = arith.constant 0 : index
    %51 = vector.load %arg4[%c0_16, %c0_17, %c0_18] : memref<1x1x128xf32, #tpu.memory_space<vmem>>, vector<1x1x128xf32>
    tpu.vector_store %arg4[%c0_16, %c0_17, %c0_18], %50 {strides = array<i32>} : memref<1x1x128xf32, #tpu.memory_space<vmem>>, vector<1x1x128xf32>,
    return
  }
  func.func @transform_0(%arg0: i32) -> (i32, i32) {
    %c0_i32 = arith.constant 0 : i32
    %c0_i32_0 = arith.constant 0 : i32
    return %arg0, %c0_i32 : i32, i32
  }
  func.func @transform_1(%arg0: i32) -> (i32, i32) {
    %c0_i32 = arith.constant 0 : i32
    %c0_i32_0 = arith.constant 0 : i32
    return %arg0, %c0_i32 : i32, i32
  }
  func.func @transform_2(%arg0: i32) -> (i32, i32) {
    %c0_i32 = arith.constant 0 : i32
    %c0_i32_0 = arith.constant 0 : i32
    return %arg0, %c0_i32 : i32, i32
  }
  func.func @transform_3(%arg0: i32) -> (i32, i32, i32) {
    %c0_i32 = arith.constant 0 : i32
    %c0_i32_0 = arith.constant 0 : i32
    %c0_i32_1 = arith.constant 0 : i32
    return %arg0, %c0_i32, %c0_i32_0 : i32, i32, i32
  }
}

</mosaic_0001>

<bundles_post_ra>
// kernel: tpu_custom_call.1
= control target key start
LH: loop header
LB: loop body
LE: loop exit
PB: predicated region body
PF: predicated region fallthrough
CT: control target
= control target key end

     0   :  { %8 = vsyncpa [#allocation3], 0  ;;  %s292_s0 = inlined_call_operand.hbm [shape: f32[2,8], index: 0, kind: input, shape index: {}]   ;;  %s293_s1 = inlined_call_operand.hbm [shape: s32[2,8], index: 1, kind: input, shape index: {}]   ;;  %s294_s2 = inlined_call_operand.hbm [shape: f32[2,8], index: 2, kind: input, shape index: {}]   ;;  %s295_s3 = inlined_call_operand.hbm [shape: f32[1,1,128], index: 3, kind: output, shape index: {}]  }
   0x1   :  { %9 = vsyncpa [#allocation6], 0  ;;  %s27_s14 = sshll.u32 %s293_s1, 4  ;;  %s28_s14 = int_to_ptr.hbm [resolvable:$true] %s27_s14 }
   0x2   :  { %10 = vsyncpa [#allocation4], 0  ;;  %s253_s15 = smov [#allocation5]   ;;  %s16_s19 = sshll.u32 %s292_s0, 4  ;;  %s17_s19 = int_to_ptr.hbm [resolvable:$true] %s16_s19 }
   0x3   :  { %s29_s16 = sshll.u32 %s253_s15, 4  ;;  %s254_s20 = smov [#allocation2]   ;;  %s30_s16 = int_to_ptr.vmem [resolvable:$true] %s29_s16 }
   0x4   :  { %32 = dma.hbm_to_vmem [thread:$0]  %s28_s14, 32, %s30_s16, [#allocation6]  }
   0x5   :  { %s18_s21 = sshll.u32 %s254_s20, 4  ;;  %s38_s24 = sshll.u32 %s294_s2, 4  ;;  %s19_s21 = int_to_ptr.vmem [resolvable:$true] %s18_s21  ;;  %s39_s24 = int_to_ptr.hbm [resolvable:$true] %s38_s24 }
   0x6   :  { %21 = dma.hbm_to_vmem [thread:$0]  %s17_s19, 32, %s19_s21, [#allocation3]  }
   0x7   :  { %s255_s1 = smov [#allocation7]  }
   0x8   :  { %s40_s25 = sshll.u32 %s255_s1, 4  ;;  %s41_s25 = int_to_ptr.vmem [resolvable:$true] %s40_s25 }
   0x9   :  { %43 = dma.hbm_to_vmem [thread:$0]  %s39_s24, 32, %s41_s25, [#allocation6]  }
   0xa   :  { %247 = dma.done.wait [#allocation3], 32  }
   0xb   :  { %248 = vsyncadd [#allocation3], 4294967264 }
   0xc   :  { %249 = dma.done.wait [#allocation6], 64  }
   0xd   :  { %250 = vsyncadd [#allocation6], 4294967232  ;;  %v58_v0 = vld [vmem:[#allocation5] sm:$0x3]  ;;  %v256_v1 = vmov 0.0   ;;  %s257_s0 = smov 8   ;;  %v69_v7 = vlaneseq }
   0xe   :  { %vm59_vm0 = vcmp.gt.s32.totalorder %v58_v0, 0  ;;  %vm62_vm1 = vcmask 1047616   ;;  %s258_s2 = smov 121   ;;  %v56_v10 = vld [vmem:[#allocation2] sm:$0x3]  ;;  %vm93_vm3 = vcmask 58368  }
   0xf   :  { %v139_v2 = vsel %vm59_vm0, 1.0, %v256_v1  ;;  %v70_v8 = vand.u32 127, %v69_v7  ;;  %v57_v11 = vld [vmem:[#allocation7] sm:$0x3]  ;;  %s259_s26 = smov [#allocation8]   ;;  %s128_s4 = sshll.u32 %s295_s3, 4  ;;  %s129_s4 = int_to_ptr.hbm [resolvable:$true] %s128_s4 }
  0x10   :  { %63 = vrot.lane.b32.xlu0 %v139_v2, %s257_s0  ;;  %v91_v12 = vmul.f32 %v57_v11, %v56_v10  ;;  %s126_s27 = sshll.u32 %s259_s26, 4  ;;  %s127_s27 = int_to_ptr.vmem [resolvable:$true] %s126_s27 }
  0x11   :  { %v75_v9 = vand.u32 7, %v70_v8  ;;  %vm115_vm4 = vcmp.eq.s32.totalorder %v70_v8, 1  ;;  %vm114_vm5 = vcmp.eq.s32.totalorder %v70_v8, 0 }
  0x13   :  { %vm83_vm2 = vcmp.eq.s32.totalorder %v75_v9, 0 }
  0x82   :  { %v64_v3 = vpop.permute.xlu0 %63 }
  0x83   :  { %v65_v4 = vsel %vm62_vm1, %v64_v3, %v139_v2 }
  0x84   :  { %66 = vrot.lane.b32.xlu0 %v65_v4, %s257_s0 }
  0xf6   :  { %v67_v5 = vpop.permute.xlu0 %66 }
  0xf7   :  { %v68_v6 = vsel %vm62_vm1, %v67_v5, %v139_v2 }
  0xf8   :  { %87 = vrot.lane.b32.xlu1 %v68_v6, %s258_s2 }
 0x16a   :  { %v88_v13 = vpop.permute.xlu1 %87 }
 0x16b   :  { %v90_v14 = vsel %vm83_vm2, 1.0, %v88_v13 }
 0x16c   :  { %v92_v15 = vmul.f32 %v91_v12, %v90_v14  ;;  %v104_v16 = vsel %vm93_vm3, %v90_v14, 0.0 }
 0x16d   :  { %105 = vadd.xlane.f32.xlu2 %v104_v16 }
 0x16e   :  { %v94_v17 = vsel %vm93_vm3, %v92_v15, 0.0 }
 0x16f   :  { %95 = vadd.xlane.f32.xlu1 %v94_v17 }
 0x1e0   :  { %v106_v18 = vpop.xlane.xlu2 %105 }
 0x1e1   :  { %v107_v19 = vrot.slane %v106_v18, 4 }
 0x1e2   :  { %v96_v20 = vpop.xlane.xlu1 %95 }
 0x1e3   :  { %v108_v21 = vadd.f32 %v107_v19, %v106_v18  ;;  %v97_v22 = vrot.slane %v96_v20, 4 }
 0x1e5   :  { %v109_v23 = vrot.slane %v108_v21, 2  ;;  %v98_v24 = vadd.f32 %v97_v22, %v96_v20 }
 0x1e7   :  { %v110_v25 = vadd.f32 %v109_v23, %v108_v21  ;;  %v99_v26 = vrot.slane %v98_v24, 2 }
 0x1e9   :  { %v100_v27 = vadd.f32 %v99_v26, %v98_v24  ;;  %v111_v28 = vrot.slane %v110_v25, 1 }
 0x1eb   :  { %v101_v29 = vrot.slane %v100_v27, 1  ;;  %v112_v31 = vadd.f32 %v111_v28, %v110_v25 }
 0x1ed   :  { %v102_v30 = vadd.f32 %v101_v29, %v100_v27 }
 0x1ef   :  { %140 = vpush %v102_v30 }
 0x1f0   :  { %142 = vpush %v112_v31 }
 0x220   :  { %s141_s28 = spop %140 }
 0x221   :  { %v118_v32 = vstv %s141_s28  ;;  %s143_s5 = spop %142 }
 0x222   :  { %v116_v33 = vstv %s143_s5 }
 0x223   :  { %v117_v34 = vsel %vm115_vm4, %v116_v33, 0.0 }
 0x224   :  { %v119_v35 = vsel %vm114_vm5, %v118_v32, %v117_v34 }
 0x225   :  { %120 = vst [vmem:[#allocation8] sm:$0x1] %v119_v35 }
 0x226   :  { %131 = dma.vmem_to_hbm [thread:$0]  %s127_s27, 16, %s129_s4, [#allocation4]  }
 0x227   :  { %251 = dma.done.wait [#allocation4], 16  }
 0x228   :  { %252 = vsyncadd [#allocation4], 4294967280 }
 0x229   :  { %136 = vsyncpa [#allocation3], 1 }
 0x22a   :  { %137 = vsyncpa [#allocation6], 1 }
 0x22b   :  { %138 = vsyncpa [#allocation4], 1 }

</bundles_post_ra>
